<compile_context>
chip_gen: v7x
topology: tpu7x:2x2x1
jax: 0.10.0
libtpu: 0.0.40
codegen_flags: <defaults>
</compile_context>

<pallas_src>
import jax
import jax.numpy as jnp
from jax.experimental import pallas as pl
from jax.experimental.pallas import tpu as pltpu

IN_DIM = 28 * 28
H1 = 512
H2 = 256
NUM_CLASSES = 10
OUT_PAD = 128           # lane-dense padded output width
NEG_FILL = -1e9         # neutral logit for padded classes


def mlp_log_softmax_kernel(x_ref, w1_ref, b1_ref, w2_ref, b2_ref,
                           w3_ref, b3_ref, o_ref):
    # fc1 + relu   (bf16 MXU pass, f32 accumulate)
    x = x_ref[...]
    h1 = jnp.dot(x, w1_ref[...], preferred_element_type=jnp.float32) + b1_ref[...]
    h1 = jnp.maximum(h1, 0.0)
    # fc2 + relu
    h2 = jnp.dot(h1.astype(jnp.bfloat16), w2_ref[...],
                 preferred_element_type=jnp.float32) + b2_ref[...]
    h2 = jnp.maximum(h2, 0.0)
    # fc3 (padded to 128 output lanes; padded cols = NEG_FILL, inert below)
    logits = jnp.dot(h2.astype(jnp.bfloat16), w3_ref[...],
                     preferred_element_type=jnp.float32) + b3_ref[...]
    # log_softmax over dim=-1 (numerically stable, f32).
    # exp(NEG_FILL - m) underflows to exactly 0, so padded lanes contribute
    # nothing to max/sum; real lanes match log_softmax over the 10 classes.
    m = jnp.max(logits, axis=-1, keepdims=True)
    shifted = logits - m
    lse = jnp.log(jnp.sum(jnp.exp(shifted), axis=-1, keepdims=True))
    o_ref[...] = shifted - lse


def _round_up(x, m):
    return (x + m - 1) // m * m


def net_forward(x, params, *, tb=256):
    """x: [B, 1, 28, 28] or [B, 784].  Returns log-probs [B, 10] (f32)."""
    w1, b1, w2, b2, w3, b3 = params
    x = x.reshape(-1, IN_DIM)
    B = x.shape[0]

    # Batch tile: multiple of 8 (sublane), capped at `tb` (256 default).
    TB = min(tb, _round_up(B, 8))
    B_pad = _round_up(B, TB)
    if B_pad != B:
        x = jnp.pad(x, ((0, B_pad - B), (0, 0)))

    # bf16 datapath; f32 accumulation happens inside the kernel.
    x = x.astype(jnp.bfloat16)
    w1 = w1.astype(jnp.bfloat16)
    w2 = w2.astype(jnp.bfloat16)
    b1 = b1.astype(jnp.float32)
    b2 = b2.astype(jnp.float32)
    # Pad fc3 to 128 output lanes: zero weight cols, NEG_FILL bias cols.
    w3p = jnp.pad(w3.astype(jnp.bfloat16), ((0, 0), (0, OUT_PAD - NUM_CLASSES)))
    b3p = jnp.pad(b3.astype(jnp.float32), ((0, 0), (0, OUT_PAD - NUM_CLASSES)),
                  constant_values=NEG_FILL)

    grid = (B_pad // TB,)

    def resident(arr):
        # Same block index every grid step -> stays VMEM-resident, no re-DMA.
        return pl.BlockSpec(arr.shape, lambda i: (0, 0))

    out = pl.pallas_call(
        mlp_log_softmax_kernel,
        out_shape=jax.ShapeDtypeStruct((B_pad, OUT_PAD), jnp.float32),
        grid=grid,
        in_specs=[
            pl.BlockSpec((TB, IN_DIM), lambda i: (i, 0)),   # x tile (pipelined)
            resident(w1), resident(b1),
            resident(w2), resident(b2),
            resident(w3p), resident(b3p),
        ],
        out_specs=pl.BlockSpec((TB, OUT_PAD), lambda i: (i, 0)),
        compiler_params=pltpu.CompilerParams(
            dimension_semantics=("parallel",),
        ),
    )(x, w1, b1, w2, b2, w3p, b3p)

    return out[:B, :NUM_CLASSES]


def init_params(key):
    """Deterministic init mirroring nn.Linear shapes (stored as [in, out])."""
    k1, k2, k3, k4, k5, k6 = jax.random.split(key, 6)

    def linear(kw, kb, fan_in, fan_out):
        bound = 1.0 / jnp.sqrt(fan_in)
        w = jax.random.uniform(kw, (fan_in, fan_out), jnp.float32, -bound, bound)
        b = jax.random.uniform(kb, (1, fan_out), jnp.float32, -bound, bound)
        return w, b

    w1, b1 = linear(k1, k2, IN_DIM, H1)
    w2, b2 = linear(k3, k4, H1, H2)
    w3, b3 = linear(k5, k6, H2, NUM_CLASSES)
    return (w1, b1, w2, b2, w3, b3)


def _reference(x, params):
    """Pure-JAX f32 reference of the PyTorch forward."""
    w1, b1, w2, b2, w3, b3 = params
    x = x.reshape(-1, IN_DIM).astype(jnp.float32)
    h1 = jnp.maximum(x @ w1 + b1, 0.0)
    h2 = jnp.maximum(h1 @ w2 + b2, 0.0)
    logits = h2 @ w3 + b3
    return jax.nn.log_softmax(logits, axis=-1)


if __name__ == "__main__":
    key = jax.random.PRNGKey(0)
    kp, kx = jax.random.split(key)
    params = init_params(kp)

    # small batch of "MNIST-like" inputs (latency-only at this size)
    x = jax.random.normal(kx, (8, 1, 28, 28), jnp.float32)
    out = jax.block_until_ready(net_forward(x, params))
    assert out.shape == (8, NUM_CLASSES)
    row_sums = jnp.sum(jnp.exp(out), axis=-1)
    assert bool(jnp.all(jnp.abs(row_sums - 1.0) < 1e-3))
    ref = _reference(x, params)
    assert bool(jnp.max(jnp.abs(out - ref)) < 8e-2)  # bf16 matmul tolerance

    # exercise the gridded/padded path (B=300 -> TB=128, 3 grid steps)
    x2 = jax.random.normal(kx, (300, 1, 28, 28), jnp.float32)
    out2 = jax.block_until_ready(net_forward(x2, params, tb=128))
    assert out2.shape == (300, NUM_CLASSES)
    row_sums2 = jnp.sum(jnp.exp(out2), axis=-1)
    assert bool(jnp.all(jnp.abs(row_sums2 - 1.0) < 1e-3))
    ref2 = _reference(x2, params)
    assert bool(jnp.max(jnp.abs(out2 - ref2)) < 8e-2)

    print("KERNEL_OK")
</pallas_src>

<mosaic_0001>
module attributes {stable_mosaic.version = 11 : i64} {
  func.func @mlp_log_softmax_kernel(%arg0: i32, %arg1: memref<8x784xbf16, #tpu.memory_space<vmem>>, %arg2: memref<784x512xbf16, #tpu.memory_space<vmem>>, %arg3: memref<1x512xf32, #tpu.memory_space<vmem>>, %arg4: memref<512x256xbf16, #tpu.memory_space<vmem>>, %arg5: memref<1x256xf32, #tpu.memory_space<vmem>>, %arg6: memref<256x128xbf16, #tpu.memory_space<vmem>>, %arg7: memref<1x128xf32, #tpu.memory_space<vmem>>, %arg8: memref<8x128xf32, #tpu.memory_space<vmem>>) attributes {dimension_semantics = [#tpu.dimension_semantics<parallel>], iteration_bounds = array<i64: 1>, scalar_prefetch = 0 : i64, scratch_operands = 0 : i64, tpu.core_type = #tpu.core_type<tc>, window_params = [{transform_indices = @transform_0, window_bounds = array<i64: 8, 784>}, {pipeline_mode = #tpu.pipeline_mode<synchronous>, transform_indices = @transform_1, window_bounds = array<i64: 784, 512>}, {pipeline_mode = #tpu.pipeline_mode<synchronous>, transform_indices = @transform_2, window_bounds = array<i64: 1, 512>}, {pipeline_mode = #tpu.pipeline_mode<synchronous>, transform_indices = @transform_3, window_bounds = array<i64: 512, 256>}, {pipeline_mode = #tpu.pipeline_mode<synchronous>, transform_indices = @transform_4, window_bounds = array<i64: 1, 256>}, {pipeline_mode = #tpu.pipeline_mode<synchronous>, transform_indices = @transform_5, window_bounds = array<i64: 256, 128>}, {pipeline_mode = #tpu.pipeline_mode<synchronous>, transform_indices = @transform_6, window_bounds = array<i64: 1, 128>}, {transform_indices = @transform_7, window_bounds = array<i64: 8, 128>}]} {
    %c0 = arith.constant 0 : index
    %c0_0 = arith.constant 0 : index
    %0 = vector.load %arg1[%c0, %c0_0] : memref<8x784xbf16, #tpu.memory_space<vmem>>, vector<8x784xbf16>
    %c0_1 = arith.constant 0 : index
    %c0_2 = arith.constant 0 : index
    %1 = vector.load %arg2[%c0_1, %c0_2] : memref<784x512xbf16, #tpu.memory_space<vmem>>, vector<784x512xbf16>
    %cst = arith.constant dense<0.000000e+00> : vector<8x512xf32>
    %2 = tpu.matmul %0, %1, %cst {dimension_numbers = #tpu.dot_dimension_numbers<[1], [0], [0], [1], [0, 0, 1, 1], [], []>} : vector<8x784xbf16>, vector<784x512xbf16>, vector<8x512xf32> -> vector<8x512xf32>
    %c0_3 = arith.constant 0 : index
    %c0_4 = arith.constant 0 : index
    %3 = vector.load %arg3[%c0_3, %c0_4] : memref<1x512xf32, #tpu.memory_space<vmem>>, vector<1x512xf32>
    %4 = vector.broadcast %3 : vector<1x512xf32> to vector<8x512xf32>
    %5 = arith.addf %2, %4 : vector<8x512xf32>
    %cst_5 = arith.constant 0.000000e+00 : f32
    %6 = vector.broadcast %cst_5 : f32 to vector<8x512xf32>
    %7 = arith.maximumf %5, %6 : vector<8x512xf32>
    %8 = arith.truncf %7 : vector<8x512xf32> to vector<8x512xbf16>
    %c0_6 = arith.constant 0 : index
    %c0_7 = arith.constant 0 : index
    %9 = vector.load %arg4[%c0_6, %c0_7] : memref<512x256xbf16, #tpu.memory_space<vmem>>, vector<512x256xbf16>
    %cst_8 = arith.constant dense<0.000000e+00> : vector<8x256xf32>
    %10 = tpu.matmul %8, %9, %cst_8 {dimension_numbers = #tpu.dot_dimension_numbers<[1], [0], [0], [1], [0, 0, 1, 1], [], []>} : vector<8x512xbf16>, vector<512x256xbf16>, vector<8x256xf32> -> vector<8x256xf32>
    %c0_9 = arith.constant 0 : index
    %c0_10 = arith.constant 0 : index
    %11 = vector.load %arg5[%c0_9, %c0_10] : memref<1x256xf32, #tpu.memory_space<vmem>>, vector<1x256xf32>
    %12 = vector.broadcast %11 : vector<1x256xf32> to vector<8x256xf32>
    %13 = arith.addf %10, %12 : vector<8x256xf32>
    %cst_11 = arith.constant 0.000000e+00 : f32
    %14 = vector.broadcast %cst_11 : f32 to vector<8x256xf32>
    %15 = arith.maximumf %13, %14 : vector<8x256xf32>
    %16 = arith.truncf %15 : vector<8x256xf32> to vector<8x256xbf16>
    %c0_12 = arith.constant 0 : index
    %c0_13 = arith.constant 0 : index
    %17 = vector.load %arg6[%c0_12, %c0_13] : memref<256x128xbf16, #tpu.memory_space<vmem>>, vector<256x128xbf16>
    %cst_14 = arith.constant dense<0.000000e+00> : vector<8x128xf32>
    %18 = tpu.matmul %16, %17, %cst_14 {dimension_numbers = #tpu.dot_dimension_numbers<[1], [0], [0], [1], [0, 0, 1, 1], [], []>} : vector<8x256xbf16>, vector<256x128xbf16>, vector<8x128xf32> -> vector<8x128xf32>
    %c0_15 = arith.constant 0 : index
    %c0_16 = arith.constant 0 : index
    %19 = vector.load %arg7[%c0_15, %c0_16] : memref<1x128xf32, #tpu.memory_space<vmem>>, vector<1x128xf32>
    %20 = vector.broadcast %19 : vector<1x128xf32> to vector<8x128xf32>
    %21 = arith.addf %18, %20 : vector<8x128xf32>
    %cst_17 = arith.constant dense<0xFF800000> : vector<8xf32>
    %22 = vector.multi_reduction <maximumf>, %21, %cst_17 [1] : vector<8x128xf32> to vector<8xf32>
    %23 = vector.shape_cast %22 : vector<8xf32> to vector<8x1xf32>
    %24 = vector.broadcast %23 : vector<8x1xf32> to vector<8x128xf32>
    %25 = arith.subf %21, %24 : vector<8x128xf32>
    %26 = math.exp %25 : vector<8x128xf32>
    %cst_18 = arith.constant dense<0.000000e+00> : vector<8xf32>
    %27 = vector.multi_reduction <add>, %26, %cst_18 [1] : vector<8x128xf32> to vector<8xf32>
    %28 = vector.shape_cast %27 : vector<8xf32> to vector<8x1xf32>
    %29 = math.log %28 : vector<8x1xf32>
    %30 = vector.broadcast %29 : vector<8x1xf32> to vector<8x128xf32>
    %31 = arith.subf %25, %30 : vector<8x128xf32>
    %c0_19 = arith.constant 0 : index
    %c0_20 = arith.constant 0 : index
    %32 = vector.load %arg8[%c0_19, %c0_20] : memref<8x128xf32, #tpu.memory_space<vmem>>, vector<8x128xf32>
    tpu.vector_store %arg8[%c0_19, %c0_20], %31 {strides = array<i32>} : memref<8x128xf32, #tpu.memory_space<vmem>>, vector<8x128xf32>,
    return
  }
  func.func @transform_0(%arg0: i32) -> (i32, i32) {
    %c0_i32 = arith.constant 0 : i32
    %c0_i32_0 = arith.constant 0 : i32
    return %arg0, %c0_i32 : i32, i32
  }
  func.func @transform_1(%arg0: i32) -> (i32, i32) {
    %c0_i32 = arith.constant 0 : i32
    %c0_i32_0 = arith.constant 0 : i32
    %c0_i32_1 = arith.constant 0 : i32
    return %c0_i32, %c0_i32_0 : i32, i32
  }
  func.func @transform_2(%arg0: i32) -> (i32, i32) {
    %c0_i32 = arith.constant 0 : i32
    %c0_i32_0 = arith.constant 0 : i32
    %c0_i32_1 = arith.constant 0 : i32
    return %c0_i32, %c0_i32_0 : i32, i32
  }
  func.func @transform_3(%arg0: i32) -> (i32, i32) {
    %c0_i32 = arith.constant 0 : i32
    %c0_i32_0 = arith.constant 0 : i32
    %c0_i32_1 = arith.constant 0 : i32
    return %c0_i32, %c0_i32_0 : i32, i32
  }
  func.func @transform_4(%arg0: i32) -> (i32, i32) {
    %c0_i32 = arith.constant 0 : i32
    %c0_i32_0 = arith.constant 0 : i32
    %c0_i32_1 = arith.constant 0 : i32
    return %c0_i32, %c0_i32_0 : i32, i32
  }
  func.func @transform_5(%arg0: i32) -> (i32, i32) {
    %c0_i32 = arith.constant 0 : i32
    %c0_i32_0 = arith.constant 0 : i32
    %c0_i32_1 = arith.constant 0 : i32
    return %c0_i32, %c0_i32_0 : i32, i32
  }
  func.func @transform_6(%arg0: i32) -> (i32, i32) {
    %c0_i32 = arith.constant 0 : i32
    %c0_i32_0 = arith.constant 0 : i32
    %c0_i32_1 = arith.constant 0 : i32
    return %c0_i32, %c0_i32_0 : i32, i32
  }
  func.func @transform_7(%arg0: i32) -> (i32, i32) {
    %c0_i32 = arith.constant 0 : i32
    %c0_i32_0 = arith.constant 0 : i32
    return %arg0, %c0_i32 : i32, i32
  }
}

</mosaic_0001>

<bundles_post_ra>
// kernel: tpu_custom_call.1
= control target key start
LH: loop header
LB: loop body
LE: loop exit
PB: predicated region body
PF: predicated region fallthrough
CT: control target
= control target key end

     0   :  { %12 = vsyncpa [#allocation3], 0  ;;  %s3394_s0 = inlined_call_operand.hbm [shape: bf16[8,784], index: 0, kind: input, shape index: {}]   ;;  %s3395_s1 = inlined_call_operand.hbm [shape: bf16[784,512], index: 1, kind: input, shape index: {}]   ;;  %s3396_s2 = inlined_call_operand.vmem [shape: f32[1,512], index: 2, kind: input, shape index: {}]   ;;  %s3397_s3 = inlined_call_operand.hbm [shape: bf16[512,256], index: 3, kind: input, shape index: {}]   ;;  %s3398_s4 = inlined_call_operand.vmem [shape: f32[1,256], index: 4, kind: input, shape index: {}]   ;;  %s3399_s5 = inlined_call_operand.hbm [shape: bf16[256,128], index: 5, kind: input, shape index: {}]   ;;  %s3400_s6 = inlined_call_operand.vmem [shape: f32[1,128], index: 6, kind: input, shape index: {}]   ;;  %s3401_s7 = inlined_call_operand.hbm [shape: f32[8,128], index: 7, kind: output, shape index: {}]  }
   0x1   :  { %13 = vsyncpa [#allocation6], 0 }
   0x2   :  { %14 = vsyncpa [#allocation9], 0 }
   0x3   :  { %15 = vsyncpa [#allocation4], 0  ;;  %s3217_s24 = smov [#allocation5]   ;;  %s3099_s28 = scalar_lea.hbm %s3395_s1, 25088 }
   0x4   :  { %s31_s25 = sshll.u32 %s3217_s24, 4  ;;  %p3100_p0 = scmp.ne.s32.totalorder %s3395_s1, %s3099_s28  ;;  %s32_s25 = int_to_ptr.vmem [resolvable:$true] %s31_s25 }
   0x5   :  { %p3103_p1 = scmp.lt.u32.totalorder %s3099_s28, %s3395_s1 }
   0x7   :  { %p3105_p2 = pnand %p3103_p1, %p3100_p0 }
   0x9   :  { %3108 = shalt.err (!%p3105_p2)
}
   0xa   :  { %s3109_s10 = scalar_lea.vmem %s32_s25, 25088  ;;  %p3114_p4 = scmp.lt.s32.totalorder %s32_s25, %s32_s25 }
   0xb   :  { %p3110_p3 = scmp.ne.s32.totalorder %s32_s25, %s3109_s10  ;;  %p3115_p5 = scmp.lt.s32.totalorder %s3109_s10, %s3109_s10 }
   0xd   :  { %p3116_p6 = por %p3115_p5, %p3114_p4 }
   0xf   :  { %p3117_p7 = pnand %p3116_p6, %p3110_p3 }
  0x11   :  { %3120 = shalt.err (!%p3117_p7)
}
  0x12   :  { %s3218_s11 = smov 256   ;;  %s3219_s12 = smov 16  }
  0x13   :  { %37 = dma.hbm_to_vmem [thread:$0]  %s3395_s1, 25088, %s32_s25, [#allocation6], %s3218_s11, %s3218_s11, %s3219_s12  }
  0x14   :  { %s3220_s15 = smov [#allocation2]   ;;  %s3221_s17 = smov [#allocation7]  }
  0x15   :  { %s22_s16 = sshll.u32 %s3220_s15, 4  ;;  %s45_s18 = sshll.u32 %s3221_s17, 4  ;;  %s23_s16 = int_to_ptr.vmem [resolvable:$true] %s22_s16  ;;  %s46_s18 = int_to_ptr.vmem [resolvable:$true] %s45_s18 }
  0x16   :  { %s3121_s21 = scalar_lea.hbm %s3394_s0, 448 }
  0x17   :  { %p3122_p8 = scmp.ne.s32.totalorder %s3394_s0, %s3121_s21  ;;  %p3125_p9 = scmp.lt.u32.totalorder %s3121_s21, %s3394_s0 }
  0x19   :  { %p3127_p10 = pnand %p3125_p9, %p3122_p8 }
  0x1b   :  { %3130 = shalt.err (!%p3127_p10)
}
  0x1c   :  { %s3131_s1 = scalar_lea.vmem %s23_s16, 448  ;;  %p3136_p12 = scmp.lt.s32.totalorder %s23_s16, %s23_s16 }
  0x1d   :  { %p3132_p11 = scmp.ne.s32.totalorder %s23_s16, %s3131_s1  ;;  %p3137_p13 = scmp.lt.s32.totalorder %s3131_s1, %s3131_s1 }
  0x1f   :  { %p3138_p0 = por %p3137_p13, %p3136_p12 }
  0x21   :  { %p3139_p1 = pnand %p3138_p0, %p3132_p11 }
  0x23   :  { %3142 = shalt.err (!%p3139_p1)
}
  0x24   :  { %25 = dma.hbm_to_vmem [thread:$0]  %s3394_s0, 448, %s23_s16, [#allocation3]  }
  0x25   :  { %s3143_s30 = scalar_lea.hbm %s3397_s3, 8192 }
  0x26   :  { %p3144_p2 = scmp.ne.s32.totalorder %s3397_s3, %s3143_s30  ;;  %p3147_p3 = scmp.lt.u32.totalorder %s3143_s30, %s3397_s3 }
  0x28   :  { %p3149_p4 = pnand %p3147_p3, %p3144_p2 }
  0x2a   :  { %3152 = shalt.err (!%p3149_p4)
}
  0x2b   :  { %s3153_s12 = scalar_lea.vmem %s46_s18, 8192  ;;  %p3158_p6 = scmp.lt.s32.totalorder %s46_s18, %s46_s18 }
  0x2c   :  { %p3154_p5 = scmp.ne.s32.totalorder %s46_s18, %s3153_s12  ;;  %p3159_p7 = scmp.lt.s32.totalorder %s3153_s12, %s3153_s12 }
  0x2e   :  { %p3160_p8 = por %p3159_p7, %p3158_p6 }
  0x30   :  { %p3161_p9 = pnand %p3160_p8, %p3154_p5 }
  0x32   :  { %3164 = shalt.err (!%p3161_p9)
}
  0x33   :  { %s3222_s0 = smov 128   ;;  %s3223_s13 = smov 8  }
  0x34   :  { %51 = dma.hbm_to_vmem [thread:$0]  %s3397_s3, 8192, %s46_s18, [#allocation6], %s3222_s0, %s3222_s0, %s3223_s13  }
  0x35   :  { %s3224_s16 = smov [#allocation8]   ;;  %s3165_s21 = scalar_lea.hbm %s3399_s5, 2048 }
  0x36   :  { %s59_s17 = sshll.u32 %s3224_s16, 4  ;;  %p3166_p10 = scmp.ne.s32.totalorder %s3399_s5, %s3165_s21  ;;  %s60_s17 = int_to_ptr.vmem [resolvable:$true] %s59_s17 }
  0x37   :  { %p3169_p11 = scmp.lt.u32.totalorder %s3165_s21, %s3399_s5 }
  0x39   :  { %p3171_p12 = pnand %p3169_p11, %p3166_p10 }
  0x3b   :  { %3174 = shalt.err (!%p3171_p12)
}
  0x3c   :  { %s3175_s1 = scalar_lea.vmem %s60_s17, 2048  ;;  %p3180_p0 = scmp.lt.s32.totalorder %s60_s17, %s60_s17 }
  0x3d   :  { %p3176_p13 = scmp.ne.s32.totalorder %s60_s17, %s3175_s1  ;;  %p3181_p1 = scmp.lt.s32.totalorder %s3175_s1, %s3175_s1 }
  0x3f   :  { %p3182_p2 = por %p3181_p1, %p3180_p0 }
  0x41   :  { %p3183_p3 = pnand %p3182_p2, %p3176_p13 }
  0x43   :  { %3186 = shalt.err (!%p3183_p3)
}
  0x44   :  { %s3225_s3 = smov 64   ;;  %s3226_s18 = smov 4  }
  0x45   :  { %65 = dma.hbm_to_vmem [thread:$0]  %s3399_s5, 2048, %s60_s17, [#allocation9], %s3225_s3, %s3225_s3, %s3226_s18  }
  0x46   :  { %3209 = dma.done.wait [#allocation3], 448  }
  0x47   :  { %3210 = vsyncadd [#allocation3], 4294966848 }
  0x48   :  { %3211 = dma.done.wait [#allocation6], 33280  }
  0x49   :  { %3212 = vsyncadd [#allocation6], 4294934016 }
  0x4a   :  { %3213 = dma.done.wait [#allocation9], 2048  }
  0x4b   :  { %3214 = vsyncadd [#allocation9], 4294965248  ;;  %v2682_v0 = vld [vmem:[#allocation5 + $0x4] ss:$16 sps:$4 sm:$0xff]   ;;  %v2686_v2 = vld [vmem:[#allocation5] ss:$16 sps:$4 sm:$0xff]  }
  0x4c   :  { %v2684_v1 = vld [vmem:[#allocation5 + $0x204] ss:$16 sps:$4 sm:$0xff]   ;;  %1311 = vmatprep.subr.bf16.mxu1 %v2682_v0  ;;  %v2687_v3 = vld [vmem:[#allocation5 + $0x200] ss:$16 sps:$4 sm:$0xff]   ;;  %vm1307_vm0 = vcmask 130048   ;;  %s3228_s8 = smov [#allocation10]  }
  0x4d   :  { %1352 = vmatprep.subr.bf16.mxu0 %v2684_v1  ;;  %v2688_v4 = vld [vmem:[#allocation5 + $0x24] ss:$16 sps:$4 sm:$0xff]   ;;  %1312 = vmatpush1.bf16.msra.mxu1 %v2686_v2  ;;  %v2692_v6 = vld [vmem:[#allocation5 + $0x20] ss:$16 sps:$4 sm:$0xff]   ;;  %s2321_s9 = sshll.u32 %s3228_s8, 4  ;;  %s2322_s9 = int_to_ptr.vmem [resolvable:$true] %s2321_s9 }
  0x4e   :  { %1353 = vmatpush1.bf16.msra.mxu0 %v2687_v3  ;;  %v2690_v5 = vld [vmem:[#allocation5 + $0x224] ss:$16 sps:$4 sm:$0xff]   ;;  %1313 = vmatprep.subr.bf16.mxu1 %v2688_v4  ;;  %v2693_v7 = vld [vmem:[#allocation5 + $0x220] ss:$16 sps:$4 sm:$0xff]   ;;  %p3192_p5 = scmp.lt.s32.totalorder %s2322_s9, %s2322_s9 }
  0x4f   :  { %1354 = vmatprep.subr.bf16.mxu0 %v2690_v5  ;;  %v2694_v8 = vld [vmem:[#allocation5 + $0x44] ss:$16 sps:$4 sm:$0xff]   ;;  %v2698_v10 = vld [vmem:[#allocation5 + $0x40] ss:$16 sps:$4 sm:$0xff]   ;;  %v2787_v5 = vld [vmem:[#allocation5 + $0xc] ss:$16 sps:$4 sm:$0xff]  }
  0x50   :  { %v2696_v9 = vld [vmem:[#allocation5 + $0x244] ss:$16 sps:$4 sm:$0xff]   ;;  %v2699_v11 = vld [vmem:[#allocation5 + $0x240] ss:$16 sps:$4 sm:$0xff]  }
  0x51   :  { %1314 = vmatpush1.bf16.msra.mxu1 %v2692_v6  ;;  %v2700_v12 = vld [vmem:[#allocation5 + $0x64] ss:$16 sps:$4 sm:$0xff]   ;;  %v2704_v14 = vld [vmem:[#allocation5 + $0x60] ss:$16 sps:$4 sm:$0xff]  }
  0x52   :  { %1355 = vmatpush1.bf16.msra.mxu0 %v2693_v7  ;;  %1315 = vmatprep.subr.bf16.mxu1 %v2694_v8  ;;  %v2702_v13 = vld [vmem:[#allocation5 + $0x264] ss:$16 sps:$4 sm:$0xff]   ;;  %v2705_v15 = vld [vmem:[#allocation5 + $0x260] ss:$16 sps:$4 sm:$0xff]  }
  0x53   :  { %1356 = vmatprep.subr.bf16.mxu0 %v2696_v9  ;;  %v2706_v16 = vld [vmem:[#allocation5 + $0x84] ss:$16 sps:$4 sm:$0xff]   ;;  %v2710_v18 = vld [vmem:[#allocation5 + $0x80] ss:$16 sps:$4 sm:$0xff]   ;;  %v2785_v9 = vld [vmem:[#allocation5 + $0x8] ss:$16 sps:$4 sm:$0xff]  }
  0x54   :  { %v2708_v17 = vld [vmem:[#allocation5 + $0x284] ss:$16 sps:$4 sm:$0xff]   ;;  %v2711_v19 = vld [vmem:[#allocation5 + $0x280] ss:$16 sps:$4 sm:$0xff]  }
  0x55   :  { %1316 = vmatpush1.bf16.msra.mxu1 %v2698_v10  ;;  %v2712_v20 = vld [vmem:[#allocation5 + $0xa4] ss:$16 sps:$4 sm:$0xff]   ;;  %v2716_v22 = vld [vmem:[#allocation5 + $0xa0] ss:$16 sps:$4 sm:$0xff]  }
  0x56   :  { %1357 = vmatpush1.bf16.msra.mxu0 %v2699_v11  ;;  %1317 = vmatprep.subr.bf16.mxu1 %v2700_v12  ;;  %v2714_v21 = vld [vmem:[#allocation5 + $0x2a4] ss:$16 sps:$4 sm:$0xff]   ;;  %v2717_v23 = vld [vmem:[#allocation5 + $0x2a0] ss:$16 sps:$4 sm:$0xff]   ;;  %v2793_v11 = vld [vmem:[#allocation5 + $0x2c] ss:$16 sps:$4 sm:$0xff]  }
  0x57   :  { %1358 = vmatprep.subr.bf16.mxu0 %v2702_v13  ;;  %v2718_v24 = vld [vmem:[#allocation5 + $0xc4] ss:$16 sps:$4 sm:$0xff]   ;;  %v2722_v26 = vld [vmem:[#allocation5 + $0xc0] ss:$16 sps:$4 sm:$0xff]   ;;  %v2791_v13 = vld [vmem:[#allocation5 + $0x28] ss:$16 sps:$4 sm:$0xff]  }
  0x58   :  { %v2720_v25 = vld [vmem:[#allocation5 + $0x2c4] ss:$16 sps:$4 sm:$0xff]   ;;  %v2723_v27 = vld [vmem:[#allocation5 + $0x2c0] ss:$16 sps:$4 sm:$0xff]  }
  0x59   :  { %1318 = vmatpush1.bf16.msra.mxu1 %v2704_v14  ;;  %v2724_v28 = vld [vmem:[#allocation5 + $0xe4] ss:$16 sps:$4 sm:$0xff]   ;;  %v2728_v30 = vld [vmem:[#allocation5 + $0xe0] ss:$16 sps:$4 sm:$0xff]  }
  0x5a   :  { %1359 = vmatpush1.bf16.msra.mxu0 %v2705_v15  ;;  %1319 = vmatprep.subr.bf16.mxu1 %v2706_v16  ;;  %v2726_v29 = vld [vmem:[#allocation5 + $0x2e4] ss:$16 sps:$4 sm:$0xff]   ;;  %v2729_v31 = vld [vmem:[#allocation5 + $0x2e0] ss:$16 sps:$4 sm:$0xff]   ;;  %v2799_v15 = vld [vmem:[#allocation5 + $0x4c] ss:$16 sps:$4 sm:$0xff]  }
  0x5b   :  { %1360 = vmatprep.subr.bf16.mxu0 %v2708_v17  ;;  %v2730_v32 = vld [vmem:[#allocation5 + $0x104] ss:$16 sps:$4 sm:$0xff]   ;;  %v2734_v34 = vld [vmem:[#allocation5 + $0x100] ss:$16 sps:$4 sm:$0xff]   ;;  %v2797_v17 = vld [vmem:[#allocation5 + $0x48] ss:$16 sps:$4 sm:$0xff]  }
  0x5c   :  { %v2732_v33 = vld [vmem:[#allocation5 + $0x304] ss:$16 sps:$4 sm:$0xff]   ;;  %v2735_v35 = vld [vmem:[#allocation5 + $0x300] ss:$16 sps:$4 sm:$0xff]  }
  0x5d   :  { %1320 = vmatpush1.bf16.msra.mxu1 %v2710_v18  ;;  %v2736_v36 = vld [vmem:[#allocation5 + $0x124] ss:$16 sps:$4 sm:$0xff]   ;;  %v2740_v38 = vld [vmem:[#allocation5 + $0x120] ss:$16 sps:$4 sm:$0xff]  }
  0x5e   :  { %1361 = vmatpush1.bf16.msra.mxu0 %v2711_v19  ;;  %1321 = vmatprep.subr.bf16.mxu1 %v2712_v20  ;;  %v2738_v37 = vld [vmem:[#allocation5 + $0x324] ss:$16 sps:$4 sm:$0xff]   ;;  %v2741_v39 = vld [vmem:[#allocation5 + $0x320] ss:$16 sps:$4 sm:$0xff]   ;;  %v2805_v19 = vld [vmem:[#allocation5 + $0x6c] ss:$16 sps:$4 sm:$0xff]  }
  0x5f   :  { %1362 = vmatprep.subr.bf16.mxu0 %v2714_v21  ;;  %v2742_v40 = vld [vmem:[#allocation5 + $0x144] ss:$16 sps:$4 sm:$0xff]   ;;  %v2746_v42 = vld [vmem:[#allocation5 + $0x140] ss:$16 sps:$4 sm:$0xff]   ;;  %v2803_v21 = vld [vmem:[#allocation5 + $0x68] ss:$16 sps:$4 sm:$0xff]  }
  0x60   :  { %v2744_v41 = vld [vmem:[#allocation5 + $0x344] ss:$16 sps:$4 sm:$0xff]   ;;  %v2747_v43 = vld [vmem:[#allocation5 + $0x340] ss:$16 sps:$4 sm:$0xff]  }
  0x61   :  { %1322 = vmatpush1.bf16.msra.mxu1 %v2716_v22  ;;  %v2748_v44 = vld [vmem:[#allocation5 + $0x164] ss:$16 sps:$4 sm:$0xff]   ;;  %v82_v48 = vld [vmem:[#allocation2 + $0x8] sm:$0xff] }
  0x62   :  { %1363 = vmatpush1.bf16.msra.mxu0 %v2717_v23  ;;  %1323 = vmatprep.subr.bf16.mxu1 %v2718_v24  ;;  %v2750_v45 = vld [vmem:[#allocation5 + $0x364] ss:$16 sps:$4 sm:$0xff]   ;;  %v2752_v49 = vld [vmem:[#allocation5 + $0x160] ss:$16 sps:$4 sm:$0xff]   ;;  %v3319_v51 = vcombine.high %v82_v48, %v82_v48  ;;  %v3325_v7 = vcombine.low %v82_v48, %v82_v48  ;;  %v2811_v23 = vld [vmem:[#allocation5 + $0x8c] ss:$16 sps:$4 sm:$0xff]  }
  0x63   :  { %1364 = vmatprep.subr.bf16.mxu0 %v2720_v25  ;;  %v81_v46 = vld [vmem:[#allocation2] sm:$0xff]  ;;  %v2753_v50 = vld [vmem:[#allocation5 + $0x360] ss:$16 sps:$4 sm:$0xff]  }
  0x64   :  { %v3317_v47 = vcombine.high %v81_v46, %v81_v46  ;;  %v2754_v52 = vld [vmem:[#allocation5 + $0x184] ss:$16 sps:$4 sm:$0xff]   ;;  %1384 = vmatprep.mubr.bf16.mxu0 %v3319_v51  ;;  %v2758_v54 = vld [vmem:[#allocation5 + $0x180] ss:$16 sps:$4 sm:$0xff]   ;;  %v3323_v6 = vcombine.low %v81_v46, %v81_v46  ;;  %v2809_v25 = vld [vmem:[#allocation5 + $0x88] ss:$16 sps:$4 sm:$0xff]  }
  0x65   :  { %1324 = vmatpush1.bf16.msra.mxu1 %v2722_v26  ;;  %v2756_v53 = vld [vmem:[#allocation5 + $0x384] ss:$16 sps:$4 sm:$0xff]   ;;  %v2759_v55 = vld [vmem:[#allocation5 + $0x380] ss:$16 sps:$4 sm:$0xff]  }
  0x66   :  { %1365 = vmatpush1.bf16.msra.mxu0 %v2723_v27  ;;  %1325 = vmatprep.subr.bf16.mxu1 %v2724_v28  ;;  %v2760_v56 = vld [vmem:[#allocation5 + $0x1a4] ss:$16 sps:$4 sm:$0xff]   ;;  %v2764_v58 = vld [vmem:[#allocation5 + $0x1a0] ss:$16 sps:$4 sm:$0xff]   ;;  %v2817_v27 = vld [vmem:[#allocation5 + $0xac] ss:$16 sps:$4 sm:$0xff]  }
  0x67   :  { %1366 = vmatprep.subr.bf16.mxu0 %v2726_v29  ;;  %1343 = vmatprep.mubr.bf16.mxu1 %v3317_v47  ;;  %v2762_v57 = vld [vmem:[#allocation5 + $0x3a4] ss:$16 sps:$4 sm:$0xff]   ;;  %v2765_v59 = vld [vmem:[#allocation5 + $0x3a0] ss:$16 sps:$4 sm:$0xff]   ;;  %v2815_v29 = vld [vmem:[#allocation5 + $0xa8] ss:$16 sps:$4 sm:$0xff]  }
  0x68   :  { %v2766_v60 = vld [vmem:[#allocation5 + $0x1c4] ss:$16 sps:$4 sm:$0xff]   ;;  %v2770_v62 = vld [vmem:[#allocation5 + $0x1c0] ss:$16 sps:$4 sm:$0xff]  }
  0x69   :  { %1326 = vmatpush1.bf16.msra.mxu1 %v2728_v30  ;;  %v2768_v61 = vld [vmem:[#allocation5 + $0x3c4] ss:$16 sps:$4 sm:$0xff]   ;;  %v2771_v63 = vld [vmem:[#allocation5 + $0x3c0] ss:$16 sps:$4 sm:$0xff]  }
  0x6a   :  { %1367 = vmatpush1.bf16.msra.mxu0 %v2729_v31  ;;  %1327 = vmatprep.subr.bf16.mxu1 %v2730_v32  ;;  %v2772_v0 = vld [vmem:[#allocation5 + $0x1e4] ss:$16 sps:$4 sm:$0xff]   ;;  %v2776_v2 = vld [vmem:[#allocation5 + $0x1e0] ss:$16 sps:$4 sm:$0xff]   ;;  %v2823_v31 = vld [vmem:[#allocation5 + $0xcc] ss:$16 sps:$4 sm:$0xff]  }
  0x6b   :  { %1368 = vmatprep.subr.bf16.mxu0 %v2732_v33  ;;  %v2774_v1 = vld [vmem:[#allocation5 + $0x3e4] ss:$16 sps:$4 sm:$0xff]   ;;  %v2777_v3 = vld [vmem:[#allocation5 + $0x3e0] ss:$16 sps:$4 sm:$0xff]  }
  0x6c   :  { %v2784_v4 = vld [vmem:[#allocation5 + $0x404] ss:$16 sps:$4 sm:$0xff]   ;;  %v2782_v8 = vld [vmem:[#allocation5 + $0x400] ss:$16 sps:$4 sm:$0xff]  }
  0x6d   :  { %1328 = vmatpush1.bf16.msra.mxu1 %v2734_v34  ;;  %v2790_v10 = vld [vmem:[#allocation5 + $0x424] ss:$16 sps:$4 sm:$0xff]   ;;  %v2788_v12 = vld [vmem:[#allocation5 + $0x420] ss:$16 sps:$4 sm:$0xff]  }
  0x6e   :  { %1369 = vmatpush1.bf16.msra.mxu0 %v2735_v35  ;;  %1329 = vmatprep.subr.bf16.mxu1 %v2736_v36  ;;  %v2796_v14 = vld [vmem:[#allocation5 + $0x444] ss:$16 sps:$4 sm:$0xff]   ;;  %v2794_v16 = vld [vmem:[#allocation5 + $0x440] ss:$16 sps:$4 sm:$0xff]   ;;  %v2821_v35 = vld [vmem:[#allocation5 + $0xc8] ss:$16 sps:$4 sm:$0xff]  }
  0x6f   :  { %1370 = vmatprep.subr.bf16.mxu0 %v2738_v37  ;;  %v2802_v18 = vld [vmem:[#allocation5 + $0x464] ss:$16 sps:$4 sm:$0xff]   ;;  %v2800_v20 = vld [vmem:[#allocation5 + $0x460] ss:$16 sps:$4 sm:$0xff]   ;;  %v2829_v37 = vld [vmem:[#allocation5 + $0xec] ss:$16 sps:$4 sm:$0xff]  }
  0x70   :  { %v2808_v22 = vld [vmem:[#allocation5 + $0x484] ss:$16 sps:$4 sm:$0xff]   ;;  %v2806_v24 = vld [vmem:[#allocation5 + $0x480] ss:$16 sps:$4 sm:$0xff]  }
  0x71   :  { %1330 = vmatpush1.bf16.msra.mxu1 %v2740_v38  ;;  %v2814_v26 = vld [vmem:[#allocation5 + $0x4a4] ss:$16 sps:$4 sm:$0xff]   ;;  %v2812_v28 = vld [vmem:[#allocation5 + $0x4a0] ss:$16 sps:$4 sm:$0xff]  }
  0x72   :  { %1371 = vmatpush1.bf16.msra.mxu0 %v2741_v39  ;;  %1331 = vmatprep.subr.bf16.mxu1 %v2742_v40  ;;  %v2820_v30 = vld [vmem:[#allocation5 + $0x4c4] ss:$16 sps:$4 sm:$0xff]   ;;  %v2818_v33 = vld [vmem:[#allocation5 + $0x4c0] ss:$16 sps:$4 sm:$0xff]   ;;  %v2827_v39 = vld [vmem:[#allocation5 + $0xe8] ss:$16 sps:$4 sm:$0xff]  }
  0x73   :  { %1372 = vmatprep.subr.bf16.mxu0 %v2744_v41  ;;  %v3330_v32 = vld [vmem:[#allocation2 + $0x10] sm:$0xff]  ;;  %v2824_v38 = vld [vmem:[#allocation5 + $0x4e0] ss:$16 sps:$4 sm:$0xff]   ;;  %v2835_v41 = vld [vmem:[#allocation5 + $0x10c] ss:$16 sps:$4 sm:$0xff]  }
  0x74   :  { %v3334_v34 = vcombine.high %v3330_v32, %v3330_v32  ;;  %v2826_v36 = vld [vmem:[#allocation5 + $0x4e4] ss:$16 sps:$4 sm:$0xff]   ;;  %v2836_v46 = vld [vmem:[#allocation5 + $0x520] ss:$16 sps:$4 sm:$0xff]  }
  0x75   :  { %1332 = vmatpush1.bf16.msra.mxu1 %v2746_v42  ;;  %v2832_v40 = vld [vmem:[#allocation5 + $0x504] ss:$16 sps:$4 sm:$0xff]   ;;  %v2830_v42 = vld [vmem:[#allocation5 + $0x500] ss:$16 sps:$4 sm:$0xff]  }
  0x76   :  { %1373 = vmatpush1.bf16.msra.mxu0 %v2747_v43  ;;  %1333 = vmatprep.subr.bf16.mxu1 %v2748_v44  ;;  %v2833_v43 = vld [vmem:[#allocation5 + $0x108] ss:$16 sps:$4 sm:$0xff]   ;;  %v2838_v44 = vld [vmem:[#allocation5 + $0x524] ss:$16 sps:$4 sm:$0xff]  }
  0x77   :  { %1374 = vmatprep.subr.bf16.mxu0 %v2750_v45  ;;  %v2841_v45 = vld [vmem:[#allocation5 + $0x12c] ss:$16 sps:$4 sm:$0xff]   ;;  %v2844_v48 = vld [vmem:[#allocation5 + $0x544] ss:$16 sps:$4 sm:$0xff]  }
  0x79   :  { %1334 = vmatpush1.bf16.msra.mxu1 %v2752_v49  ;;  %v2847_v49 = vld [vmem:[#allocation5 + $0x14c] ss:$16 sps:$4 sm:$0xff]  }
  0x7a   :  { %1375 = vmatpush1.bf16.msra.mxu0 %v2753_v50  ;;  %1335 = vmatprep.subr.bf16.mxu1 %v2754_v52  ;;  %v2842_v50 = vld [vmem:[#allocation5 + $0x540] ss:$16 sps:$4 sm:$0xff]   ;;  %v2845_v52 = vld [vmem:[#allocation5 + $0x148] ss:$16 sps:$4 sm:$0xff]  }
  0x7b   :  { %1376 = vmatprep.subr.bf16.mxu0 %v2756_v53  ;;  %v2850_v53 = vld [vmem:[#allocation5 + $0x564] ss:$16 sps:$4 sm:$0xff]  }
  0x7d   :  { %1336 = vmatpush1.bf16.msra.mxu1 %v2758_v54  ;;  %v2853_v54 = vld [vmem:[#allocation5 + $0x16c] ss:$16 sps:$4 sm:$0xff]  }
  0x7e   :  { %1377 = vmatpush1.bf16.msra.mxu0 %v2759_v55  ;;  %1337 = vmatprep.subr.bf16.mxu1 %v2760_v56  ;;  %v2848_v55 = vld [vmem:[#allocation5 + $0x560] ss:$16 sps:$4 sm:$0xff]   ;;  %v2851_v56 = vld [vmem:[#allocation5 + $0x168] ss:$16 sps:$4 sm:$0xff]  }
  0x7f   :  { %1378 = vmatprep.subr.bf16.mxu0 %v2762_v57  ;;  %v2856_v57 = vld [vmem:[#allocation5 + $0x584] ss:$16 sps:$4 sm:$0xff]  }
  0x81   :  { %1338 = vmatpush1.bf16.msra.mxu1 %v2764_v58  ;;  %v2859_v58 = vld [vmem:[#allocation5 + $0x18c] ss:$16 sps:$4 sm:$0xff]  }
  0x82   :  { %1379 = vmatpush1.bf16.msra.mxu0 %v2765_v59  ;;  %1339 = vmatprep.subr.bf16.mxu1 %v2766_v60  ;;  %v2854_v59 = vld [vmem:[#allocation5 + $0x580] ss:$16 sps:$4 sm:$0xff]   ;;  %v2857_v60 = vld [vmem:[#allocation5 + $0x188] ss:$16 sps:$4 sm:$0xff]  }
  0x83   :  { %1380 = vmatprep.subr.bf16.mxu0 %v2768_v61  ;;  %v2862_v61 = vld [vmem:[#allocation5 + $0x5a4] ss:$16 sps:$4 sm:$0xff]  }
  0x85   :  { %1340 = vmatpush1.bf16.msra.mxu1 %v2770_v62  ;;  %v2865_v62 = vld [vmem:[#allocation5 + $0x1ac] ss:$16 sps:$4 sm:$0xff]  }
  0x86   :  { %1381 = vmatpush1.bf16.msra.mxu0 %v2771_v63  ;;  %1341 = vmatprep.subr.bf16.mxu1 %v2772_v0  ;;  %v2860_v63 = vld [vmem:[#allocation5 + $0x5a0] ss:$16 sps:$4 sm:$0xff]   ;;  %v2863_v0 = vld [vmem:[#allocation5 + $0x1a8] ss:$16 sps:$4 sm:$0xff]  }
  0x87   :  { %1382 = vmatprep.subr.bf16.mxu0 %v2774_v1  ;;  %v2868_v1 = vld [vmem:[#allocation5 + $0x5c4] ss:$16 sps:$4 sm:$0xff]  }
  0x89   :  { %1342 = vmatpush1.bf16.msra.mxu1 %v2776_v2  ;;  %v2871_v2 = vld [vmem:[#allocation5 + $0x1cc] ss:$16 sps:$4 sm:$0xff]  }
  0x8a   :  { %1383 = vmatpush1.bf16.msra.mxu0 %v2777_v3  ;;  %1475 = vmatprep.subr.bf16.mxu1 %v2787_v5  ;;  %v2866_v3 = vld [vmem:[#allocation5 + $0x5c0] ss:$16 sps:$4 sm:$0xff]   ;;  %v2874_v5 = vld [vmem:[#allocation5 + $0x5e4] ss:$16 sps:$4 sm:$0xff]  }
  0x8b   :  { %1393 = vmatprep.subr.bf16.mxu0 %v2784_v4  ;;  %v2869_v4 = vld [vmem:[#allocation5 + $0x1c8] ss:$16 sps:$4 sm:$0xff]  }
  0x8c   :  { %1344 = vmatmul.mubr.bf16.vlgmr.msra.gmra.mrb[0].mxu1 %v3323_v6 }
  0x8d   :  { %1385 = vmatmul.mubr.bf16.vlgmr.msra.gmra.mrb[0].mxu0 %v3325_v7  ;;  %1476 = vmatpush1.bf16.msra.mxu1 %v2785_v9  ;;  %v2872_v9 = vld [vmem:[#allocation5 + $0x5e0] ss:$16 sps:$4 sm:$0xff]  }
  0x8e   :  { %1394 = vmatpush1.bf16.msra.mxu0 %v2782_v8  ;;  %1477 = vmatprep.subr.bf16.mxu1 %v2793_v11  ;;  %v2877_v8 = vld [vmem:[#allocation5 + $0x1ec] ss:$16 sps:$4 sm:$0xff]  }
  0x8f   :  { %1395 = vmatprep.subr.bf16.mxu0 %v2790_v10  ;;  %1507 = vmatprep.mubr.bf16.mxu1 %v3317_v47  ;;  %v2839_v47 = vld [vmem:[#allocation5 + $0x128] ss:$16 sps:$4 sm:$0xff]   ;;  %v2882_v11 = vld [vmem:[#allocation5 + $0x20c] ss:$16 sps:$4 sm:$0xff]  }
  0x90   :  { %1425 = vmatprep.mubr.bf16.mxu0 %v3334_v34  ;;  %v2875_v10 = vld [vmem:[#allocation5 + $0x1e8] ss:$16 sps:$4 sm:$0xff]  }
  0x91   :  { %1478 = vmatpush1.bf16.msra.mxu1 %v2791_v13  ;;  %v3339_v13 = vcombine.low %v3330_v32, %v3330_v32  ;;  %v2985_v32 = vld [vmem:[#allocation7 + $0x4] ss:$8 sps:$4 sm:$0xff]  }
  0x92   :  { %1396 = vmatpush1.bf16.msra.mxu0 %v2788_v12  ;;  %1479 = vmatprep.subr.bf16.mxu1 %v2799_v15  ;;  %v2888_v12 = vld [vmem:[#allocation5 + $0x604] ss:$16 sps:$4 sm:$0xff]   ;;  %v2886_v15 = vld [vmem:[#allocation5 + $0x600] ss:$16 sps:$4 sm:$0xff]  }
  0x93   :  { %1397 = vmatprep.subr.bf16.mxu0 %v2796_v14  ;;  %v2880_v14 = vld [vmem:[#allocation5 + $0x208] ss:$16 sps:$4 sm:$0xff]  }
  0x95   :  { %1480 = vmatpush1.bf16.msra.mxu1 %v2797_v17  ;;  %v2979_v17 = vld [vmem:[#allocation5 + $0x60c] ss:$16 sps:$4 sm:$0xff]  }
  0x96   :  { %1398 = vmatpush1.bf16.msra.mxu0 %v2794_v16  ;;  %1481 = vmatprep.subr.bf16.mxu1 %v2805_v19  ;;  %v2885_v16 = vld [vmem:[#allocation5 + $0x22c] ss:$16 sps:$4 sm:$0xff]  }
  0x97   :  { %1399 = vmatprep.subr.bf16.mxu0 %v2802_v18  ;;  %v2883_v18 = vld [vmem:[#allocation5 + $0x228] ss:$16 sps:$4 sm:$0xff]   ;;  %v2891_v19 = vld [vmem:[#allocation5 + $0x24c] ss:$16 sps:$4 sm:$0xff]  }
  0x99   :  { %1482 = vmatpush1.bf16.msra.mxu1 %v2803_v21  ;;  %v2889_v21 = vld [vmem:[#allocation5 + $0x248] ss:$16 sps:$4 sm:$0xff]  }
  0x9a   :  { %1400 = vmatpush1.bf16.msra.mxu0 %v2800_v20  ;;  %1483 = vmatprep.subr.bf16.mxu1 %v2811_v23  ;;  %v3227_v20 = vmov 0   ;;  %v2892_v23 = vld [vmem:[#allocation2 + $0x18] ss:$0 sps:$4 sm:$0xff]  }
  0x9b   :  { %1401 = vmatprep.subr.bf16.mxu0 %v2808_v22  ;;  %v2895_v22 = vld [vmem:[#allocation5 + $0x26c] ss:$16 sps:$4 sm:$0xff]  }
  0x9d   :  { %1484 = vmatpush1.bf16.msra.mxu1 %v2809_v25  ;;  %v2977_v25 = vld [vmem:[#allocation5 + $0x608] ss:$16 sps:$4 sm:$0xff]  }
  0x9e   :  { %1402 = vmatpush1.bf16.msra.mxu0 %v2806_v24  ;;  %1485 = vmatprep.subr.bf16.mxu1 %v2817_v27  ;;  %v2893_v24 = vld [vmem:[#allocation5 + $0x268] ss:$16 sps:$4 sm:$0xff]   ;;  %v2901_v27 = vld [vmem:[#allocation5 + $0x2ac] ss:$16 sps:$4 sm:$0xff]  }
  0x9f   :  { %1403 = vmatprep.subr.bf16.mxu0 %v2814_v26  ;;  %v2898_v26 = vld [vmem:[#allocation5 + $0x28c] ss:$16 sps:$4 sm:$0xff]  }
  0xa1   :  { %1486 = vmatpush1.bf16.msra.mxu1 %v2815_v29  ;;  %v2902_v29 = vld [vmem:[#allocation5 + $0x2c8] ss:$16 sps:$4 sm:$0xff]  }
  0xa2   :  { %1404 = vmatpush1.bf16.msra.mxu0 %v2812_v28  ;;  %1487 = vmatprep.subr.bf16.mxu1 %v2823_v31  ;;  %v2899_v28 = vld [vmem:[#allocation5 + $0x2a8] ss:$16 sps:$4 sm:$0xff]  }
  0xa3   :  { %1405 = vmatprep.subr.bf16.mxu0 %v2820_v30  ;;  %v2907_v30 = vld [vmem:[#allocation5 + $0x2ec] ss:$16 sps:$4 sm:$0xff]   ;;  %v2983_v31 = vld [vmem:[#allocation7] ss:$8 sps:$4 sm:$0xff]  }
  0xa5   :  { %1488 = vmatpush1.bf16.msra.mxu1 %v2821_v35  ;;  %v2905_v35 = vld [vmem:[#allocation5 + $0x2e8] ss:$16 sps:$4 sm:$0xff]  }
  0xa6   :  { %1406 = vmatpush1.bf16.msra.mxu0 %v2818_v33  ;;  %1489 = vmatprep.subr.bf16.mxu1 %v2829_v37  ;;  %v2988_v33 = vld [vmem:[#allocation7 + $0x14] ss:$8 sps:$4 sm:$0xff]  }
  0xa7   :  { %1407 = vmatprep.subr.bf16.mxu0 %v2826_v36  ;;  %v2986_v36 = vld [vmem:[#allocation7 + $0x10] ss:$8 sps:$4 sm:$0xff]   ;;  %v2910_v37 = vld [vmem:[#allocation5 + $0x30c] ss:$16 sps:$4 sm:$0xff]  }
  0xa9   :  { %1490 = vmatpush1.bf16.msra.mxu1 %v2827_v39  ;;  %v2908_v39 = vld [vmem:[#allocation5 + $0x308] ss:$16 sps:$4 sm:$0xff]  }
  0xaa   :  { %1408 = vmatpush1.bf16.msra.mxu0 %v2824_v38  ;;  %1491 = vmatprep.subr.bf16.mxu1 %v2835_v41  ;;  %v2991_v38 = vld [vmem:[#allocation7 + $0x24] ss:$8 sps:$4 sm:$0xff]  }
  0xab   :  { %1409 = vmatprep.subr.bf16.mxu0 %v2832_v40  ;;  %v2989_v40 = vld [vmem:[#allocation7 + $0x20] ss:$8 sps:$4 sm:$0xff]   ;;  %v2913_v41 = vld [vmem:[#allocation5 + $0x32c] ss:$16 sps:$4 sm:$0xff]  }
  0xad   :  { %1492 = vmatpush1.bf16.msra.mxu1 %v2833_v43  ;;  %v2911_v43 = vld [vmem:[#allocation5 + $0x328] ss:$16 sps:$4 sm:$0xff]  }
  0xae   :  { %1410 = vmatpush1.bf16.msra.mxu0 %v2830_v42  ;;  %1493 = vmatprep.subr.bf16.mxu1 %v2841_v45  ;;  %v2994_v42 = vld [vmem:[#allocation7 + $0x34] ss:$8 sps:$4 sm:$0xff]  }
  0xaf   :  { %1411 = vmatprep.subr.bf16.mxu0 %v2838_v44  ;;  %v2992_v44 = vld [vmem:[#allocation7 + $0x30] ss:$8 sps:$4 sm:$0xff]   ;;  %v2916_v45 = vld [vmem:[#allocation5 + $0x34c] ss:$16 sps:$4 sm:$0xff]  }
  0xb1   :  { %1494 = vmatpush1.bf16.msra.mxu1 %v2839_v47  ;;  %v2914_v47 = vld [vmem:[#allocation5 + $0x348] ss:$16 sps:$4 sm:$0xff]  }
  0xb2   :  { %1412 = vmatpush1.bf16.msra.mxu0 %v2836_v46  ;;  %1495 = vmatprep.subr.bf16.mxu1 %v2847_v49  ;;  %v2997_v46 = vld [vmem:[#allocation7 + $0x44] ss:$8 sps:$4 sm:$0xff]  }
  0xb3   :  { %1413 = vmatprep.subr.bf16.mxu0 %v2844_v48  ;;  %v2995_v48 = vld [vmem:[#allocation7 + $0x40] ss:$8 sps:$4 sm:$0xff]   ;;  %v2919_v49 = vld [vmem:[#allocation5 + $0x36c] ss:$16 sps:$4 sm:$0xff]  }
  0xb5   :  { %1496 = vmatpush1.bf16.msra.mxu1 %v2845_v52  ;;  %v2917_v52 = vld [vmem:[#allocation5 + $0x368] ss:$16 sps:$4 sm:$0xff]  }
  0xb6   :  { %1414 = vmatpush1.bf16.msra.mxu0 %v2842_v50  ;;  %1497 = vmatprep.subr.bf16.mxu1 %v2853_v54  ;;  %v3000_v50 = vld [vmem:[#allocation7 + $0x54] ss:$8 sps:$4 sm:$0xff]  }
  0xb7   :  { %1415 = vmatprep.subr.bf16.mxu0 %v2850_v53  ;;  %v2998_v53 = vld [vmem:[#allocation7 + $0x50] ss:$8 sps:$4 sm:$0xff]   ;;  %v2922_v54 = vld [vmem:[#allocation5 + $0x38c] ss:$16 sps:$4 sm:$0xff]  }
  0xb9   :  { %1498 = vmatpush1.bf16.msra.mxu1 %v2851_v56  ;;  %v2920_v56 = vld [vmem:[#allocation5 + $0x388] ss:$16 sps:$4 sm:$0xff]  }
  0xba   :  { %1416 = vmatpush1.bf16.msra.mxu0 %v2848_v55  ;;  %1499 = vmatprep.subr.bf16.mxu1 %v2859_v58  ;;  %v3003_v55 = vld [vmem:[#allocation7 + $0x64] ss:$8 sps:$4 sm:$0xff]  }
  0xbb   :  { %1417 = vmatprep.subr.bf16.mxu0 %v2856_v57  ;;  %v3001_v57 = vld [vmem:[#allocation7 + $0x60] ss:$8 sps:$4 sm:$0xff]   ;;  %v2925_v58 = vld [vmem:[#allocation5 + $0x3ac] ss:$16 sps:$4 sm:$0xff]  }
  0xbd   :  { %1500 = vmatpush1.bf16.msra.mxu1 %v2857_v60  ;;  %v2923_v60 = vld [vmem:[#allocation5 + $0x3a8] ss:$16 sps:$4 sm:$0xff]  }
  0xbe   :  { %1418 = vmatpush1.bf16.msra.mxu0 %v2854_v59  ;;  %1501 = vmatprep.subr.bf16.mxu1 %v2865_v62  ;;  %v3006_v59 = vld [vmem:[#allocation7 + $0x74] ss:$8 sps:$4 sm:$0xff]  }
  0xbf   :  { %1419 = vmatprep.subr.bf16.mxu0 %v2862_v61  ;;  %v3004_v61 = vld [vmem:[#allocation7 + $0x70] ss:$8 sps:$4 sm:$0xff]   ;;  %v2928_v62 = vld [vmem:[#allocation5 + $0x3cc] ss:$16 sps:$4 sm:$0xff]  }
  0xc1   :  { %1502 = vmatpush1.bf16.msra.mxu1 %v2863_v0  ;;  %v2926_v0 = vld [vmem:[#allocation5 + $0x3c8] ss:$16 sps:$4 sm:$0xff]  }
  0xc2   :  { %1420 = vmatpush1.bf16.msra.mxu0 %v2860_v63  ;;  %1503 = vmatprep.subr.bf16.mxu1 %v2871_v2  ;;  %v3009_v63 = vld [vmem:[#allocation7 + $0x84] ss:$8 sps:$4 sm:$0xff]  }
  0xc3   :  { %1421 = vmatprep.subr.bf16.mxu0 %v2868_v1  ;;  %v3007_v1 = vld [vmem:[#allocation7 + $0x80] ss:$8 sps:$4 sm:$0xff]   ;;  %v2931_v2 = vld [vmem:[#allocation5 + $0x3ec] ss:$16 sps:$4 sm:$0xff]  }
  0xc5   :  { %1504 = vmatpush1.bf16.msra.mxu1 %v2869_v4  ;;  %v2929_v4 = vld [vmem:[#allocation5 + $0x3e8] ss:$16 sps:$4 sm:$0xff]  }
  0xc6   :  { %1422 = vmatpush1.bf16.msra.mxu0 %v2866_v3  ;;  %1505 = vmatprep.subr.bf16.mxu1 %v2877_v8  ;;  %v3012_v3 = vld [vmem:[#allocation7 + $0x94] ss:$8 sps:$4 sm:$0xff]  }
  0xc7   :  { %1423 = vmatprep.subr.bf16.mxu0 %v2874_v5  ;;  %v3010_v5 = vld [vmem:[#allocation7 + $0x90] ss:$8 sps:$4 sm:$0xff]   ;;  %v2934_v8 = vld [vmem:[#allocation5 + $0x40c] ss:$16 sps:$4 sm:$0xff]  }
  0xc9   :  { %1506 = vmatpush1.bf16.msra.mxu1 %v2875_v10  ;;  %v2932_v10 = vld [vmem:[#allocation5 + $0x408] ss:$16 sps:$4 sm:$0xff]  }
  0xca   :  { %1424 = vmatpush1.bf16.msra.mxu0 %v2872_v9  ;;  %1516 = vmatprep.subr.bf16.mxu1 %v2882_v11  ;;  %v3015_v9 = vld [vmem:[#allocation7 + $0xa4] ss:$8 sps:$4 sm:$0xff]  }
  0xcb   :  { %1434 = vmatprep.subr.bf16.mxu0 %v2888_v12  ;;  %v2937_v11 = vld [vmem:[#allocation5 + $0x42c] ss:$16 sps:$4 sm:$0xff]   ;;  %v3013_v12 = vld [vmem:[#allocation7 + $0xa0] ss:$8 sps:$4 sm:$0xff]  }
  0xcc   :  { %1508 = vmatmul.mubr.bf16.vlgmr.msra.gmra.mrb[4].mxu1 %v3323_v6  ;;  %v2896_v6 = vld [vmem:[#allocation5 + $0x288] ss:$16 sps:$4 sm:$0xff]  }
  0xcd   :  { %1426 = vmatmul.mubr.bf16.vlgmr.msra.gmra.mrb[0].mxu0 %v3339_v13  ;;  %1517 = vmatpush1.bf16.msra.mxu1 %v2880_v14  ;;  %v3018_v14 = vld [vmem:[#allocation7 + $0xb4] ss:$8 sps:$4 sm:$0xff]  }
  0xce   :  { %1435 = vmatpush1.bf16.msra.mxu0 %v2886_v15  ;;  %1518 = vmatprep.subr.bf16.mxu1 %v2885_v16  ;;  %v2935_v15 = vld [vmem:[#allocation5 + $0x428] ss:$16 sps:$4 sm:$0xff]   ;;  %v2940_v16 = vld [vmem:[#allocation5 + $0x44c] ss:$16 sps:$4 sm:$0xff]  }
  0xcf   :  { %1466 = vmatprep.mubr.bf16.mxu0 %v3227_v20  ;;  %1548 = vmatprep.mubr.bf16.mxu1 %v3319_v51  ;;  %v2904_v51 = vld [vmem:[#allocation5 + $0x2cc] ss:$16 sps:$4 sm:$0xff]  }
  0xd0   :  { %1598 = vmatprep.subr.bf16.mxu0 %v2979_v17  ;;  %v3016_v17 = vld [vmem:[#allocation7 + $0xb0] ss:$8 sps:$4 sm:$0xff]  }
  0xd1   :  { %1519 = vmatpush1.bf16.msra.mxu1 %v2883_v18  ;;  %v3021_v18 = vld [vmem:[#allocation7 + $0xc4] ss:$8 sps:$4 sm:$0xff]  }
  0xd2   :  { %1520 = vmatprep.subr.bf16.mxu1 %v2891_v19  ;;  %v2938_v19 = vld [vmem:[#allocation5 + $0x448] ss:$16 sps:$4 sm:$0xff]  }
  0xd5   :  { %1521 = vmatpush1.bf16.msra.mxu1 %v2889_v21  ;;  %v3019_v21 = vld [vmem:[#allocation7 + $0xc0] ss:$8 sps:$4 sm:$0xff]  }
  0xd6   :  { %1522 = vmatprep.subr.bf16.mxu1 %v2895_v22  ;;  %v3024_v22 = vld [vmem:[#allocation7 + $0xd4] ss:$8 sps:$4 sm:$0xff]  }
  0xd9   :  { %2535 = vmatmul.mubr.msk.bf16.vlgmr.msra.gmra.mrb[0].mxu0 %vm1307_vm0, %v2892_v23  ;;  %1523 = vmatpush1.bf16.msra.mxu1 %v2893_v24  ;;  %v2944_v24 = vld [vmem:[#allocation5 + $0x488] ss:$16 sps:$4 sm:$0xff]  }
  0xda   :  { %1599 = vmatpush1.bf16.msra.mxu0 %v2977_v25  ;;  %1524 = vmatprep.subr.bf16.mxu1 %v2898_v26  ;;  %v2949_v25 = vld [vmem:[#allocation5 + $0x4ac] ss:$16 sps:$4 sm:$0xff]   ;;  %v2947_v26 = vld [vmem:[#allocation5 + $0x4a8] ss:$16 sps:$4 sm:$0xff]  }
  0xdb   :  { %1630 = vmatprep.mubr.bf16.mxu0 %v3227_v20  ;;  %2043 = vmatprep.subr.bf16.mxu0 %v2985_v32  ;;  %v2943_v20 = vld [vmem:[#allocation5 + $0x46c] ss:$16 sps:$4 sm:$0xff]  }
  0xdc   :  { %v3027_v32 = vld [vmem:[#allocation7 + $0xe4] ss:$8 sps:$4 sm:$0xff]  }
  0xdd   :  { %1525 = vmatpush1.bf16.msra.mxu1 %v2896_v6  ;;  %v2952_v6 = vld [vmem:[#allocation5 + $0x4cc] ss:$16 sps:$4 sm:$0xff]  }
  0xde   :  { %1526 = vmatprep.subr.bf16.mxu1 %v2901_v27  ;;  %v2950_v27 = vld [vmem:[#allocation5 + $0x4c8] ss:$16 sps:$4 sm:$0xff]  }
  0xe1   :  { %2536 = vmatmul.mubr.msk.bf16.vlgmr.msra.gmra.mrb[4].mxu0 %vm1307_vm0, %v2892_v23  ;;  %1527 = vmatpush1.bf16.msra.mxu1 %v2899_v28  ;;  %v2946_v23 = vld [vmem:[#allocation5 + $0x48c] ss:$16 sps:$4 sm:$0xff]  }
  0xe2   :  { %1528 = vmatprep.subr.bf16.mxu1 %v2904_v51  ;;  %2044 = vmatpush1.bf16.msra.mxu0 %v2983_v31  ;;  %v2955_v28 = vld [vmem:[#allocation5 + $0x4ec] ss:$16 sps:$4 sm:$0xff]   ;;  %v2953_v51 = vld [vmem:[#allocation5 + $0x4e8] ss:$16 sps:$4 sm:$0xff]  }
  0xe3   :  { %2045 = vmatprep.subr.bf16.mxu0 %v2988_v33  ;;  %v2961_v31 = vld [vmem:[#allocation5 + $0x52c] ss:$16 sps:$4 sm:$0xff]   ;;  %v3025_v33 = vld [vmem:[#allocation7 + $0xe0] ss:$8 sps:$4 sm:$0xff]  }
  0xe5   :  { %1529 = vmatpush1.bf16.msra.mxu1 %v2902_v29  ;;  %v2958_v29 = vld [vmem:[#allocation5 + $0x50c] ss:$16 sps:$4 sm:$0xff]  }
  0xe6   :  { %1530 = vmatprep.subr.bf16.mxu1 %v2907_v30  ;;  %2046 = vmatpush1.bf16.msra.mxu0 %v2986_v36  ;;  %v2956_v30 = vld [vmem:[#allocation5 + $0x508] ss:$16 sps:$4 sm:$0xff]   ;;  %v2964_v36 = vld [vmem:[#allocation5 + $0x54c] ss:$16 sps:$4 sm:$0xff]  }
  0xe7   :  { %2047 = vmatprep.subr.bf16.mxu0 %v2991_v38  ;;  %v3028_v38 = vld [vmem:[#allocation7 + $0xf0] ss:$8 sps:$4 sm:$0xff]  }
  0xe9   :  { %1531 = vmatpush1.bf16.msra.mxu1 %v2905_v35  ;;  %v2959_v35 = vld [vmem:[#allocation5 + $0x528] ss:$16 sps:$4 sm:$0xff]  }
  0xea   :  { %1532 = vmatprep.subr.bf16.mxu1 %v2910_v37  ;;  %2048 = vmatpush1.bf16.msra.mxu0 %v2989_v40  ;;  %v3030_v37 = vld [vmem:[#allocation7 + $0xf4] ss:$8 sps:$4 sm:$0xff]  }
  0xeb   :  { %2049 = vmatprep.subr.bf16.mxu0 %v2994_v42  ;;  %v2967_v40 = vld [vmem:[#allocation5 + $0x56c] ss:$16 sps:$4 sm:$0xff]   ;;  %v2965_v42 = vld [vmem:[#allocation5 + $0x568] ss:$16 sps:$4 sm:$0xff]  }
  0xed   :  { %1533 = vmatpush1.bf16.msra.mxu1 %v2908_v39  ;;  %v2962_v39 = vld [vmem:[#allocation5 + $0x548] ss:$16 sps:$4 sm:$0xff]  }
  0xee   :  { %1534 = vmatprep.subr.bf16.mxu1 %v2913_v41  ;;  %2050 = vmatpush1.bf16.msra.mxu0 %v2992_v44  ;;  %v3033_v41 = vld [vmem:[#allocation7 + $0x104] ss:$8 sps:$4 sm:$0xff]   ;;  %v2968_v44 = vld [vmem:[#allocation5 + $0x588] ss:$16 sps:$4 sm:$0xff]  }
  0xef   :  { %2051 = vmatprep.subr.bf16.mxu0 %v2997_v46  ;;  %v2971_v46 = vld [vmem:[#allocation5 + $0x5a8] ss:$16 sps:$4 sm:$0xff]  }
  0xf1   :  { %1535 = vmatpush1.bf16.msra.mxu1 %v2911_v43  ;;  %v2970_v43 = vld [vmem:[#allocation5 + $0x58c] ss:$16 sps:$4 sm:$0xff]  }
  0xf2   :  { %1536 = vmatprep.subr.bf16.mxu1 %v2916_v45  ;;  %2052 = vmatpush1.bf16.msra.mxu0 %v2995_v48  ;;  %v2973_v45 = vld [vmem:[#allocation5 + $0x5ac] ss:$16 sps:$4 sm:$0xff]   ;;  %v2974_v48 = vld [vmem:[#allocation5 + $0x5c8] ss:$16 sps:$4 sm:$0xff]  }
  0xf3   :  { %2053 = vmatprep.subr.bf16.mxu0 %v3000_v50  ;;  %v2980_v50 = vld [vmem:[#allocation5 + $0x5e8] ss:$16 sps:$4 sm:$0xff]  }
  0xf5   :  { %1537 = vmatpush1.bf16.msra.mxu1 %v2914_v47  ;;  %v2976_v47 = vld [vmem:[#allocation5 + $0x5cc] ss:$16 sps:$4 sm:$0xff]  }
  0xf6   :  { %1538 = vmatprep.subr.bf16.mxu1 %v2919_v49  ;;  %2054 = vmatpush1.bf16.msra.mxu0 %v2998_v53  ;;  %v2982_v49 = vld [vmem:[#allocation5 + $0x5ec] ss:$16 sps:$4 sm:$0xff]  }
  0xf7   :  { %2055 = vmatprep.subr.bf16.mxu0 %v3003_v55 }
  0xf9   :  { %1539 = vmatpush1.bf16.msra.mxu1 %v2917_v52 }
  0xfa   :  { %1540 = vmatprep.subr.bf16.mxu1 %v2922_v54  ;;  %2056 = vmatpush1.bf16.msra.mxu0 %v3001_v57 }
  0xfb   :  { %2057 = vmatprep.subr.bf16.mxu0 %v3006_v59  ;;  %v3353_v59 = vld [vmem:[%s3396_s2] sm:$0xf] }
  0xfd   :  { %1541 = vmatpush1.bf16.msra.mxu1 %v2920_v56  ;;  %v283_v56 = vlaneseq }
  0xfe   :  { %1542 = vmatprep.subr.bf16.mxu1 %v2925_v58  ;;  %2058 = vmatpush1.bf16.msra.mxu0 %v3004_v61 }
  0xff   :  { %2059 = vmatprep.subr.bf16.mxu0 %v3009_v63  ;;  %v3347_v57 = vshrl.u32 %v283_v56, 7  ;;  %v3079_v63 = vld [vmem:[#allocation8 + $0x40] sm:$0xff]   ;;  %v3078_v56 = vld [vmem:[#allocation7 + $0x1f4] ss:$8 sps:$4 sm:$0xff]  }
 0x101   :  { %1543 = vmatpush1.bf16.msra.mxu1 %v2923_v60  ;;  %v285_v58 = vsub.s32 0, %v3347_v57  ;;  %v289_v60 = vsub.s32 1, %v3347_v57 }
 0x102   :  { %1544 = vmatprep.subr.bf16.mxu1 %v2928_v62  ;;  %2060 = vmatpush1.bf16.msra.mxu0 %v3007_v1  ;;  %v3081_v1 = vld [vmem:[#allocation8 + $0x48] sm:$0xff]  }
 0x103   :  { %2061 = vmatprep.subr.bf16.mxu0 %v3012_v3  ;;  %v290_v61 = vrot.slane %v3353_v59, %v289_v60 }
 0x105   :  { %1545 = vmatpush1.bf16.msra.mxu1 %v2926_v0  ;;  %v3080_v0 = vld [vmem:[#allocation8] sm:$0xff]  }
 0x106   :  { %1546 = vmatprep.subr.bf16.mxu1 %v2931_v2  ;;  %2062 = vmatpush1.bf16.msra.mxu0 %v3010_v5 }
 0x107   :  { %2063 = vmatprep.subr.bf16.mxu0 %v3015_v9 }
 0x109   :  { %1547 = vmatpush1.bf16.msra.mxu1 %v2929_v4 }
 0x10a   :  { %1557 = vmatprep.subr.bf16.mxu1 %v2934_v8  ;;  %2064 = vmatpush1.bf16.msra.mxu0 %v3013_v12 }
 0x10b   :  { %2065 = vmatprep.subr.bf16.mxu0 %v3018_v14  ;;  %v3083_v14 = vld [vmem:[#allocation8 + $0x50] sm:$0xff]  }
 0x10c   :  { %1549 = vmatmul.mubr.bf16.vlgmr.msra.gmra.mrb[4].mxu1 %v3325_v7  ;;  %v2941_v7 = vld [vmem:[#allocation5 + $0x468] ss:$16 sps:$4 sm:$0xff]  }
 0x10d   :  { %1558 = vmatpush1.bf16.msra.mxu1 %v2932_v10  ;;  %1589 = vmatprep.mubr.bf16.mxu1 %v3334_v34  ;;  %v3022_v34 = vld [vmem:[#allocation7 + $0xd0] ss:$8 sps:$4 sm:$0xff]   ;;  %v3082_v10 = vld [vmem:[#allocation8 + $0x8] sm:$0xff]  }
 0x10e   :  { %1559 = vmatprep.subr.bf16.mxu1 %v2937_v11  ;;  %2066 = vmatpush1.bf16.msra.mxu0 %v3016_v17  ;;  %v3031_v17 = vld [vmem:[#allocation7 + $0x100] ss:$8 sps:$4 sm:$0xff]  }
 0x10f   :  { %2067 = vmatprep.subr.bf16.mxu0 %v3021_v18  ;;  %v3084_v18 = vld [vmem:[#allocation8 + $0x10] sm:$0xff]  }
 0x111   :  { %1560 = vmatpush1.bf16.msra.mxu1 %v2935_v15 }
 0x112   :  { %1561 = vmatprep.subr.bf16.mxu1 %v2940_v16  ;;  %2068 = vmatpush1.bf16.msra.mxu0 %v3019_v21  ;;  %v3085_v21 = vld [vmem:[#allocation8 + $0x58] sm:$0xff]  }
 0x113   :  { %2069 = vmatprep.subr.bf16.mxu0 %v3024_v22 }
 0x115   :  { %1562 = vmatpush1.bf16.msra.mxu1 %v2938_v19 }
 0x116   :  { %1563 = vmatprep.subr.bf16.mxu1 %v2943_v20  ;;  %2070 = vmatpush1.bf16.msra.mxu0 %v3022_v34  ;;  %v3036_v20 = vld [vmem:[#allocation7 + $0x114] ss:$8 sps:$4 sm:$0xff]  }
 0x117   :  { %2071 = vmatprep.subr.bf16.mxu0 %v3027_v32  ;;  %v3045_v32 = vld [vmem:[#allocation7 + $0x144] ss:$8 sps:$4 sm:$0xff]  }
 0x119   :  { %1564 = vmatpush1.bf16.msra.mxu1 %v2941_v7 }
 0x11a   :  { %1565 = vmatprep.subr.bf16.mxu1 %v2946_v23  ;;  %2072 = vmatpush1.bf16.msra.mxu0 %v3025_v33  ;;  %v3034_v23 = vld [vmem:[#allocation7 + $0x110] ss:$8 sps:$4 sm:$0xff]   ;;  %v3043_v33 = vld [vmem:[#allocation7 + $0x140] ss:$8 sps:$4 sm:$0xff]  }
 0x11b   :  { %2073 = vmatprep.subr.bf16.mxu0 %v3030_v37  ;;  %v3051_v37 = vld [vmem:[#allocation7 + $0x164] ss:$8 sps:$4 sm:$0xff]  }
 0x11d   :  { %1566 = vmatpush1.bf16.msra.mxu1 %v2944_v24  ;;  %v3086_v24 = vld [vmem:[#allocation8 + $0x18] sm:$0xff]  }
 0x11e   :  { %1567 = vmatprep.subr.bf16.mxu1 %v2949_v25  ;;  %2074 = vmatpush1.bf16.msra.mxu0 %v3028_v38  ;;  %v3039_v25 = vld [vmem:[#allocation7 + $0x124] ss:$8 sps:$4 sm:$0xff]   ;;  %v3049_v38 = vld [vmem:[#allocation7 + $0x160] ss:$8 sps:$4 sm:$0xff]  }
 0x11f   :  { %2084 = vmatprep.subr.bf16.mxu0 %v3033_v41  ;;  %v3057_v41 = vld [vmem:[#allocation7 + $0x184] ss:$8 sps:$4 sm:$0xff]  }
 0x121   :  { %1568 = vmatpush1.bf16.msra.mxu1 %v2947_v26 }
 0x122   :  { %1569 = vmatprep.subr.bf16.mxu1 %v2952_v6  ;;  %v3087_v6 = vld [vmem:[#allocation8 + $0x60] sm:$0xff]  }
 0x125   :  { %1570 = vmatpush1.bf16.msra.mxu1 %v2950_v27  ;;  %v3037_v27 = vld [vmem:[#allocation7 + $0x120] ss:$8 sps:$4 sm:$0xff]  }
 0x126   :  { %1571 = vmatprep.subr.bf16.mxu1 %v2955_v28  ;;  %v3088_v28 = vld [vmem:[#allocation8 + $0x20] sm:$0xff]  }
 0x129   :  { %1572 = vmatpush1.bf16.msra.mxu1 %v2953_v51  ;;  %v3042_v51 = vld [vmem:[#allocation7 + $0x134] ss:$8 sps:$4 sm:$0xff]  }
 0x12a   :  { %1573 = vmatprep.subr.bf16.mxu1 %v2958_v29  ;;  %v3089_v29 = vld [vmem:[#allocation8 + $0x68] sm:$0xff]  }
 0x12d   :  { %1574 = vmatpush1.bf16.msra.mxu1 %v2956_v30  ;;  %v3040_v30 = vld [vmem:[#allocation7 + $0x130] ss:$8 sps:$4 sm:$0xff]  }
 0x12e   :  { %1575 = vmatprep.subr.bf16.mxu1 %v2961_v31  ;;  %v3090_v31 = vld [vmem:[#allocation8 + $0x28] sm:$0xff]  }
 0x131   :  { %1576 = vmatpush1.bf16.msra.mxu1 %v2959_v35  ;;  %v3048_v35 = vld [vmem:[#allocation7 + $0x154] ss:$8 sps:$4 sm:$0xff]  }
 0x132   :  { %1577 = vmatprep.subr.bf16.mxu1 %v2964_v36  ;;  %v3046_v36 = vld [vmem:[#allocation7 + $0x150] ss:$8 sps:$4 sm:$0xff]  }
 0x135   :  { %1578 = vmatpush1.bf16.msra.mxu1 %v2962_v39  ;;  %v3054_v39 = vld [vmem:[#allocation7 + $0x174] ss:$8 sps:$4 sm:$0xff]  }
 0x136   :  { %1579 = vmatprep.subr.bf16.mxu1 %v2967_v40  ;;  %v3052_v40 = vld [vmem:[#allocation7 + $0x170] ss:$8 sps:$4 sm:$0xff]  }
 0x139   :  { %1580 = vmatpush1.bf16.msra.mxu1 %v2965_v42  ;;  %v3055_v42 = vld [vmem:[#allocation7 + $0x180] ss:$8 sps:$4 sm:$0xff]  }
 0x13a   :  { %1581 = vmatprep.subr.bf16.mxu1 %v2970_v43  ;;  %v3060_v43 = vld [vmem:[#allocation7 + $0x194] ss:$8 sps:$4 sm:$0xff]  }
 0x13d   :  { %1582 = vmatpush1.bf16.msra.mxu1 %v2968_v44  ;;  %v3058_v44 = vld [vmem:[#allocation7 + $0x190] ss:$8 sps:$4 sm:$0xff]  }
 0x13e   :  { %1583 = vmatprep.subr.bf16.mxu1 %v2973_v45  ;;  %v3063_v45 = vld [vmem:[#allocation7 + $0x1a4] ss:$8 sps:$4 sm:$0xff]  }
 0x141   :  { %1584 = vmatpush1.bf16.msra.mxu1 %v2971_v46  ;;  %v3061_v46 = vld [vmem:[#allocation7 + $0x1a0] ss:$8 sps:$4 sm:$0xff]  }
 0x142   :  { %1585 = vmatprep.subr.bf16.mxu1 %v2976_v47  ;;  %v3066_v47 = vld [vmem:[#allocation7 + $0x1b4] ss:$8 sps:$4 sm:$0xff]  }
 0x145   :  { %1586 = vmatpush1.bf16.msra.mxu1 %v2974_v48  ;;  %v3064_v48 = vld [vmem:[#allocation7 + $0x1b0] ss:$8 sps:$4 sm:$0xff]  }
 0x146   :  { %1587 = vmatprep.subr.bf16.mxu1 %v2982_v49  ;;  %v3069_v49 = vld [vmem:[#allocation7 + $0x1c4] ss:$8 sps:$4 sm:$0xff]  }
 0x149   :  { %1588 = vmatpush1.bf16.msra.mxu1 %v2980_v50  ;;  %v3067_v50 = vld [vmem:[#allocation7 + $0x1c0] ss:$8 sps:$4 sm:$0xff]  }
 0x14a   :  { %2618 = vmatprep.subr.bf16.mxu1 %v3079_v63 }
 0x14c   :  { %1590 = vmatmul.mubr.bf16.vlgmr.msra.gmra.mrb[4].mxu1 %v3339_v13  ;;  %v286_v13 = vrot.slane %v3353_v59, %v285_v58 }
 0x14d   :  { %2619 = vmatpush3.bf16.msra.mxu1 %v3080_v0 }
 0x14e   :  { %2620 = vmatprep.subr.bf16.mxu1 %v3081_v1 }
 0x151   :  { %2621 = vmatpush3.bf16.msra.mxu1 %v3082_v10 }
 0x152   :  { %2622 = vmatprep.subr.bf16.mxu1 %v3083_v14 }
 0x155   :  { %2623 = vmatpush3.bf16.msra.mxu1 %v3084_v18  ;;  %v3094_v18 = vld [vmem:[#allocation8 + $0x38] sm:$0xff]  }
 0x156   :  { %2624 = vmatprep.subr.bf16.mxu1 %v3085_v21 }
 0x159   :  { %2625 = vmatpush3.bf16.msra.mxu1 %v3086_v24 }
 0x15a   :  { %2626 = vmatprep.subr.bf16.mxu1 %v3087_v6 }
 0x15d   :  { %2627 = vmatpush3.bf16.msra.mxu1 %v3088_v28 }
 0x15e   :  { %2628 = vmatprep.subr.bf16.mxu1 %v3089_v29 }
 0x15f   :  { %v1345_v52 = vpop.f32.mrb[0].mxu1 }
 0x160   :  { %v1347_v53 = vpop.f32.mrb[1].mxu1  ;;  %v1346_v62 = vadd.f32 %v1345_v52, %v286_v13  ;;  %v3072_v52 = vld [vmem:[#allocation7 + $0x1d4] ss:$8 sps:$4 sm:$0xff]   ;;  %v3076_v13 = vld [vmem:[#allocation7 + $0x1f0] ss:$8 sps:$4 sm:$0xff]  }
 0x161   :  { %v1349_v54 = vpop.f32.mrb[2].mxu1  ;;  %v1348_v2 = vadd.f32 %v1347_v53, %v290_v61  ;;  %2629 = vmatpush3.bf16.msra.mxu1 %v3090_v31  ;;  %v3070_v53 = vld [vmem:[#allocation7 + $0x1d0] ss:$8 sps:$4 sm:$0xff]   ;;  %v293_v61 = vsub.s32 2, %v3347_v57 }
 0x162   :  { %v1350_v55 = vpop.f32.mrb[3].mxu1  ;;  %v3075_v54 = vld [vmem:[#allocation7 + $0x1e4] ss:$8 sps:$4 sm:$0xff]  }
 0x163   :  { %v3073_v55 = vld [vmem:[#allocation7 + $0x1e0] ss:$8 sps:$4 sm:$0xff]   ;;  %v294_v63 = vrot.slane %v3353_v59, %v293_v61 }
 0x1ac   :  { %v1468_v3 = vpop.f32.mrb[0].mxu0 }
 0x1ad   :  { %v2641_v4 = vadd.f32 %v1468_v3, %v1346_v62  ;;  %v1470_v5 = vpop.f32.mrb[1].mxu0  ;;  %v297_v62 = vsub.s32 3, %v3347_v57 }
 0x1ae   :  { %v2643_v8 = vadd.f32 %v1470_v5, %v1348_v2  ;;  %v1472_v9 = vpop.f32.mrb[2].mxu0 }
 0x1af   :  { %v1639_v11 = vmax.f32 %v2641_v4, 0.0  ;;  %v1473_v12 = vpop.f32.mrb[3].mxu0  ;;  %v298_v0 = vrot.slane %v3353_v59, %v297_v62  ;;  %v3093_v59 = vld [vmem:[#allocation8 + $0x78] sm:$0xff]  }
 0x1b0   :  { %v1640_v15 = vmax.f32 %v2643_v8, 0.0 }
 0x1b1   :  { %v1643_v19 = vpack.c.bf16 %v1639_v11, %v1639_v11 }
 0x1b2   :  { %v1644_v16 = vpack.c.bf16 %v1640_v15, %v1640_v15 }
 0x1b4   :  { %2075 = vmatprep.mubr.bf16.mxu0 %v1644_v16  ;;  %v3362_v22 = vpop.f32.mrb[4].mxu0  ;;  %v3091_v16 = vld [vmem:[#allocation8 + $0x70] sm:$0xff]  }
 0x1b5   :  { %2076 = vmatmul.mubr.bf16.vlgmr.msra.gmra.mrb[8].mxu0 %v1643_v19  ;;  %v3364_v7 = vpop.f32.mrb[5].mxu0  ;;  %2630 = vmatprep.subr.bf16.mxu1 %v3091_v16  ;;  %v1711_v19 = vld [vmem:[%s3398_s4] sm:$0x3] }
 0x1b6   :  { %2085 = vmatpush1.bf16.msra.mxu0 %v3031_v17  ;;  %v1636_v34 = vpop.f32.mrb[6].mxu0  ;;  %v3092_v17 = vld [vmem:[#allocation8 + $0x30] sm:$0xff]   ;;  %v1720_v21 = vrot.slane %v1711_v19, %v289_v60 }
 0x1b7   :  { %2086 = vmatprep.subr.bf16.mxu0 %v3036_v20  ;;  %v1637_v26 = vpop.f32.mrb[7].mxu0  ;;  %2631 = vmatpush3.bf16.msra.mxu1 %v3092_v17  ;;  %v1716_v20 = vrot.slane %v1711_v19, %v285_v58  ;;  %v2601_v58 = vld [vmem:[%s3400_s6] ss:$0 sm:$0xff]  ;;  %s3187_s6 = scalar_lea.vmem %s2322_s9, 128 }
 0x1b8   :  { %2632 = vmatprep.subr.bf16.mxu1 %v3093_v59  ;;  %p3188_p4 = scmp.ne.s32.totalorder %s2322_s9, %s3187_s6  ;;  %p3193_p6 = scmp.lt.s32.totalorder %s3187_s6, %s3187_s6 }
 0x1ba   :  { %2087 = vmatpush1.bf16.msra.mxu0 %v3034_v23  ;;  %p3194_p7 = por %p3193_p6, %p3192_p5 }
 0x1bb   :  { %2088 = vmatprep.subr.bf16.mxu0 %v3039_v25  ;;  %2633 = vmatpush3.bf16.msra.mxu1 %v3094_v18 }
 0x1bc   :  { %p3195_p8 = pnand %p3194_p7, %p3188_p4 }
 0x1be   :  { %2089 = vmatpush1.bf16.msra.mxu0 %v3037_v27 }
 0x1bf   :  { %2090 = vmatprep.subr.bf16.mxu0 %v3042_v51 }
 0x1c2   :  { %2091 = vmatpush1.bf16.msra.mxu0 %v3040_v30 }
 0x1c3   :  { %2092 = vmatprep.subr.bf16.mxu0 %v3045_v32 }
 0x1c6   :  { %2093 = vmatpush1.bf16.msra.mxu0 %v3043_v33 }
 0x1c7   :  { %2094 = vmatprep.subr.bf16.mxu0 %v3048_v35 }
 0x1ca   :  { %2095 = vmatpush1.bf16.msra.mxu0 %v3046_v36 }
 0x1cb   :  { %2096 = vmatprep.subr.bf16.mxu0 %v3051_v37 }
 0x1ce   :  { %2097 = vmatpush1.bf16.msra.mxu0 %v3049_v38 }
 0x1cf   :  { %2098 = vmatprep.subr.bf16.mxu0 %v3054_v39 }
 0x1d2   :  { %2099 = vmatpush1.bf16.msra.mxu0 %v3052_v40 }
 0x1d3   :  { %2100 = vmatprep.subr.bf16.mxu0 %v3057_v41 }
 0x1d6   :  { %2101 = vmatpush1.bf16.msra.mxu0 %v3055_v42 }
 0x1d7   :  { %2102 = vmatprep.subr.bf16.mxu0 %v3060_v43 }
 0x1da   :  { %2103 = vmatpush1.bf16.msra.mxu0 %v3058_v44 }
 0x1db   :  { %2104 = vmatprep.subr.bf16.mxu0 %v3063_v45 }
 0x1de   :  { %2105 = vmatpush1.bf16.msra.mxu0 %v3061_v46 }
 0x1df   :  { %2106 = vmatprep.subr.bf16.mxu0 %v3066_v47 }
 0x1e2   :  { %2107 = vmatpush1.bf16.msra.mxu0 %v3064_v48 }
 0x1e3   :  { %2108 = vmatprep.subr.bf16.mxu0 %v3069_v49 }
 0x1e6   :  { %2109 = vmatpush1.bf16.msra.mxu0 %v3067_v50 }
 0x1e7   :  { %2110 = vmatprep.subr.bf16.mxu0 %v3072_v52 }
 0x1ea   :  { %2111 = vmatpush1.bf16.msra.mxu0 %v3070_v53 }
 0x1eb   :  { %2112 = vmatprep.subr.bf16.mxu0 %v3075_v54 }
 0x1ee   :  { %2113 = vmatpush1.bf16.msra.mxu0 %v3073_v55 }
 0x1ef   :  { %2114 = vmatprep.subr.bf16.mxu0 %v3078_v56 }
 0x1f2   :  { %2115 = vmatpush1.bf16.msra.mxu0 %v3076_v13 }
 0x21f   :  { %v1591_v1 = vpop.f32.mrb[4].mxu1 }
 0x220   :  { %v2644_v2 = vadd.f32 %v1591_v1, %v294_v63  ;;  %v1593_v3 = vpop.f32.mrb[5].mxu1 }
 0x221   :  { %v2646_v4 = vadd.f32 %v1593_v3, %v298_v0  ;;  %v1595_v5 = vpop.f32.mrb[6].mxu1 }
 0x222   :  { %v2645_v8 = vadd.f32 %v2644_v2, %v3362_v22  ;;  %v1596_v9 = vpop.f32.mrb[7].mxu1 }
 0x223   :  { %v2647_v10 = vadd.f32 %v2646_v4, %v3364_v7 }
 0x224   :  { %v1641_v11 = vmax.f32 %v2645_v8, 0.0 }
 0x225   :  { %v1642_v12 = vmax.f32 %v2647_v10, 0.0 }
 0x226   :  { %v1645_v15 = vpack.c.bf16 %v1641_v11, %v1641_v11 }
 0x227   :  { %v1646_v14 = vpack.c.bf16 %v1642_v12, %v1642_v12 }
 0x229   :  { %2116 = vmatprep.mubr.bf16.mxu0 %v1646_v14 }
 0x22a   :  { %2117 = vmatmul.mubr.bf16.vlgmr.msra.gmra.mrb[8].mxu0 %v1645_v15 }
 0x2fd   :  { %v2118_v22 = vpop.f32.mrb[8].mxu0 }
 0x2fe   :  { %v2648_v7 = vadd.f32 %v2118_v22, %v1716_v20  ;;  %v2120_v23 = vpop.f32.mrb[9].mxu0 }
 0x2ff   :  { %v2649_v34 = vadd.f32 %v2120_v23, %v1720_v21  ;;  %v2122_v24 = vpop.f32.mrb[10].mxu0 }
 0x300   :  { %v2125_v25 = vmax.f32 %v2648_v7, 0.0  ;;  %v2123_v26 = vpop.f32.mrb[11].mxu0 }
 0x301   :  { %v2126_v6 = vmax.f32 %v2649_v34, 0.0 }
 0x302   :  { %v2127_v28 = vpack.c.bf16 %v2125_v25, %v2125_v25 }
 0x303   :  { %v2128_v27 = vpack.c.bf16 %v2126_v6, %v2126_v6 }
 0x305   :  { %2296 = vmatprep.mubr.bf16.mxu1 %v2128_v27 }
 0x306   :  { %2297 = vmatmul.mubr.bf16.vlgmr.msra.gmra.mrb[8].mxu1 %v2127_v28 }
 0x3d9   :  { %v2634_v51 = vpop.f32.mrb[8].mxu1 }
 0x3da   :  { %v2635_v29 = vpop.f32.mrb[9].mxu1 }
 0x3db   :  { %v2636_v57 = vadd.f32 %v2635_v29, %v2634_v51  ;;  %v2637_v60 = vpop.f32.mrb[10].mxu1 }
 0x3dc   :  { %v2638_v30 = vpop.f32.mrb[11].mxu1 }
 0x3dd   :  { %v2299_v31 = vadd.f32 %v2636_v57, %v2601_v58 }
 0x3df   :  { %2304 = vmax.xlane.f32.xlu0 %v2299_v31 }
 0x46c   :  { %v2305_v32 = vpop.xlane.xlu0 %2304 }
 0x46d   :  { %v2306_v33 = vsub.f32 %v2299_v31, %v2305_v32 }
 0x46f   :  { %v2307_v35 = vmul.f32 1.442695, %v2306_v33 }
 0x471   :  { %3095 = vpow2.f32 %v2307_v35 }
 0x47b   :  { %v3096_v36 = vpop.eup %3095 }
 0x47c   :  { %2309 = vadd.xlane.f32.xlu0 %v3096_v36 }
 0x509   :  { %v2310_v37 = vpop.xlane.xlu0 %2309 }
 0x50a   :  { %3097 = vlog2.f32 %v2310_v37 }
 0x514   :  { %v3098_v38 = vpop.eup %3097 }
 0x515   :  { %v2312_v39 = vmul.f32 0.6931472, %v3098_v38 }
 0x517   :  { %v2313_v40 = vsub.f32 %v2306_v33, %v2312_v39 }
 0x519   :  { %2314 = vst [vmem:[#allocation10] sm:$0xff] %v2313_v40 }
 0x51a   :  { %3198 = shalt.err (!%p3195_p8)
}
 0x51b   :  { %s3199_s12 = scalar_lea.hbm %s3401_s7, 128 }
 0x51c   :  { %p3200_p9 = scmp.ne.s32.totalorder %s3401_s7, %s3199_s12  ;;  %p3203_p10 = scmp.lt.u32.totalorder %s3199_s12, %s3401_s7 }
 0x51e   :  { %p3205_p11 = pnand %p3203_p10, %p3200_p9 }
 0x520   :  { %3208 = shalt.err (!%p3205_p11)
}
 0x521   :  { %2324 = dma.vmem_to_hbm [thread:$0]  %s2322_s9, 128, %s3401_s7, [#allocation4]  }
 0x522   :  { %3215 = dma.done.wait [#allocation4], 128  }
 0x523   :  { %3216 = vsyncadd [#allocation4], 4294967168 }
 0x524   :  { %2328 = vsyncpa [#allocation3], 1 }
 0x525   :  { %2329 = vsyncpa [#allocation6], 1 }
 0x526   :  { %2330 = vsyncpa [#allocation9], 1 }
 0x527   :  { %2331 = vsyncpa [#allocation4], 1 }

</bundles_post_ra>
